<compile_context>
chip_gen: v6e
topology: v6e:2x2x1
jax: 0.10.0
libtpu: 0.0.40
codegen_flags: <defaults>
</compile_context>

<pallas_src>
import math

import jax
import jax.numpy as jnp
from jax import lax
from jax.experimental import pallas as pl
from jax.experimental.pallas import tpu as pltpu


def _attn_kernel(q_ref, k_ref, v_ref, mask_ref, o_ref):
    # Refs arrive with the batch dim squeezed: q/k/v/o are (S, D), mask (S, S).
    d = q_ref.shape[-1]
    # Fold 1/sqrt(D) into q right after the load.
    q = q_ref[...] * jnp.float32(1.0 / math.sqrt(d))

    # qk = (q / sqrt(D)) @ k^T via a contraction over the feature axis of BOTH
    # operands -> Mosaic feeds k as the transposed MXU operand directly.
    qk = lax.dot_general(
        q, k_ref[...],
        dimension_numbers=(((1,), (1,)), ((), ())),
        preferred_element_type=jnp.float32,
    )
    qk = qk + mask_ref[...]

    # Softmax over dim=-2 (query axis): per-column normalization.
    # Sublane-axis reduction = cheap cross-vreg VALU adds; keep it as-is.
    qk = qk - jnp.max(qk, axis=-2, keepdims=True)
    e = jnp.exp(qk)
    s = jnp.sum(e, axis=-2, keepdims=True)

    # EUP approximate reciprocal + one Newton-Raphson step (keeps the divide
    # off the VALU while staying well inside the 1e-4 tolerance).
    r = pl.reciprocal(s, approx=True)
    r = r * (jnp.float32(2.0) - s * r)
    p = e * r

    # output = softmax(qk, axis=-2) @ v0   (f32 accumulate, f32 out)
    o_ref[...] = jnp.dot(p, v_ref[...], preferred_element_type=jnp.float32)


def model_forward(q7, k, v0, mask):
    """Attention per the torch module.

    q7, k, v0: [S, D] (single instance) or [B, S, D] (batched heads/layers),
               float32.
    mask:      [S, S], [1, S, S] (shared), or [B, S, S], float32 additive mask.
    Returns the same rank as q7.
    """
    squeeze_out = (q7.ndim == 2)
    if squeeze_out:
        q7, k, v0 = q7[None], k[None], v0[None]
    B, S, D = q7.shape

    if mask.ndim == 2:
        mask = mask[None]
    if mask.shape[0] == 1:
        mask_map = lambda b: (0, 0, 0)      # shared mask: stays resident in VMEM
    else:
        mask_map = lambda b: (b, 0, 0)      # per-instance mask

    # Advisory cost for XLA scheduling around the custom call.
    flops = 4 * B * S * S * D               # two MXU matmuls per instance
    transcendentals = B * S * S             # exp
    bytes_accessed = 4 * (4 * B * S * D) + 4 * int(mask.size)

    out = pl.pallas_call(
        _attn_kernel,
        out_shape=jax.ShapeDtypeStruct((B, S, D), jnp.float32),
        grid=(B,),
        in_specs=[
            pl.BlockSpec((None, S, D), lambda b: (b, 0, 0)),
            pl.BlockSpec((None, S, D), lambda b: (b, 0, 0)),
            pl.BlockSpec((None, S, D), lambda b: (b, 0, 0)),
            pl.BlockSpec((None, S, S), mask_map),
        ],
        out_specs=pl.BlockSpec((None, S, D), lambda b: (b, 0, 0)),
        compiler_params=pltpu.CompilerParams(
            dimension_semantics=("parallel",),   # megacore sharding on v7x
        ),
        cost_estimate=pl.CostEstimate(
            flops=flops,
            transcendentals=transcendentals,
            bytes_accessed=bytes_accessed,
        ),
    )(q7, k, v0, mask)

    return out[0] if squeeze_out else out


def _reference(q7, k, v0, mask):
    squeeze_out = (q7.ndim == 2)
    if squeeze_out:
        q7, k, v0 = q7[None], k[None], v0[None]
    if mask.ndim == 2:
        mask = mask[None]
    qk = jnp.einsum("bqd,bkd->bqk", q7, k) / math.sqrt(q7.shape[-1]) + mask
    m = jax.nn.softmax(qk, axis=-2)
    out = jnp.einsum("bqk,bkd->bqd", m, v0)
    return out[0] if squeeze_out else out


if __name__ == "__main__":
    B, S, D = 8, 56, 64  # 8 heads/instances, mirrors the (1, 56, 56) mask
    key = jax.random.PRNGKey(0)
    kq, kk, kv, km = jax.random.split(key, 4)

    q7 = jax.random.normal(kq, (B, S, D), dtype=jnp.float32)
    k = jax.random.normal(kk, (B, S, D), dtype=jnp.float32)
    v0 = jax.random.normal(kv, (B, S, D), dtype=jnp.float32)
    # Deterministic additive mask: ~30% of positions blocked with -1e9,
    # shared across the batch (same [1, S, S] layout as the torch spec).
    mask = jnp.where(jax.random.uniform(km, (1, S, S)) > 0.7,
                     jnp.float32(-1e9), jnp.float32(0.0))

    # Batched path (grid over heads, parallel semantics).
    out = model_forward(q7, k, v0, mask)
    out = jax.block_until_ready(out)
    ref = _reference(q7, k, v0, mask)
    assert out.shape == (B, S, D)
    assert jnp.allclose(out, ref, atol=1e-4, rtol=1e-4)

    # Single-instance (strictly 2-D, exactly the torch module) path.
    out2 = model_forward(q7[0], k[0], v0[0], mask)
    out2 = jax.block_until_ready(out2)
    ref2 = _reference(q7[0], k[0], v0[0], mask)
    assert out2.shape == (S, D)
    assert jnp.allclose(out2, ref2, atol=1e-4, rtol=1e-4)

    print("KERNEL_OK")
</pallas_src>

<mosaic_0001>
module attributes {stable_mosaic.version = 11 : i64} {
  func.func @_attn_kernel(%arg0: i32, %arg1: memref<1x56x64xf32, #tpu.memory_space<vmem>>, %arg2: memref<1x56x64xf32, #tpu.memory_space<vmem>>, %arg3: memref<1x56x64xf32, #tpu.memory_space<vmem>>, %arg4: memref<1x56x56xf32, #tpu.memory_space<vmem>>, %arg5: memref<1x56x64xf32, #tpu.memory_space<vmem>>) attributes {dimension_semantics = [#tpu.dimension_semantics<parallel>], iteration_bounds = array<i64: 8>, scalar_prefetch = 0 : i64, scratch_operands = 0 : i64, tpu.core_type = #tpu.core_type<tc>, window_params = [{transform_indices = @transform_0, window_bounds = array<i64: 1, 56, 64>}, {transform_indices = @transform_1, window_bounds = array<i64: 1, 56, 64>}, {transform_indices = @transform_2, window_bounds = array<i64: 1, 56, 64>}, {pipeline_mode = #tpu.pipeline_mode<synchronous>, transform_indices = @transform_3, window_bounds = array<i64: 1, 56, 56>}, {transform_indices = @transform_4, window_bounds = array<i64: 1, 56, 64>}]} {
    %c0 = arith.constant 0 : index
    %c0_0 = arith.constant 0 : index
    %c0_1 = arith.constant 0 : index
    %0 = vector.load %arg1[%c0, %c0_0, %c0_1] : memref<1x56x64xf32, #tpu.memory_space<vmem>>, vector<1x56x64xf32>
    %1 = vector.shape_cast %0 : vector<1x56x64xf32> to vector<56x64xf32>
    %cst = arith.constant 1.250000e-01 : f32
    %2 = vector.broadcast %cst : f32 to vector<56x64xf32>
    %3 = arith.mulf %1, %2 : vector<56x64xf32>
    %c0_2 = arith.constant 0 : index
    %c0_3 = arith.constant 0 : index
    %c0_4 = arith.constant 0 : index
    %4 = vector.load %arg2[%c0_2, %c0_3, %c0_4] : memref<1x56x64xf32, #tpu.memory_space<vmem>>, vector<1x56x64xf32>
    %5 = vector.shape_cast %4 : vector<1x56x64xf32> to vector<56x64xf32>
    %cst_5 = arith.constant dense<0.000000e+00> : vector<56x56xf32>
    %6 = tpu.matmul %3, %5, %cst_5 {dimension_numbers = #tpu.dot_dimension_numbers<[1], [1], [0], [0], [0, 0, 1, 0], [], []>} : vector<56x64xf32>, vector<56x64xf32>, vector<56x56xf32> -> vector<56x56xf32>
    %c0_6 = arith.constant 0 : index
    %c0_7 = arith.constant 0 : index
    %c0_8 = arith.constant 0 : index
    %7 = vector.load %arg4[%c0_6, %c0_7, %c0_8] : memref<1x56x56xf32, #tpu.memory_space<vmem>>, vector<1x56x56xf32>
    %8 = vector.shape_cast %7 : vector<1x56x56xf32> to vector<56x56xf32>
    %9 = arith.addf %6, %8 : vector<56x56xf32>
    %cst_9 = arith.constant dense<0xFF800000> : vector<56xf32>
    %10 = vector.multi_reduction <maximumf>, %9, %cst_9 [0] : vector<56x56xf32> to vector<56xf32>
    %11 = vector.shape_cast %10 : vector<56xf32> to vector<1x56xf32>
    %12 = vector.broadcast %11 : vector<1x56xf32> to vector<56x56xf32>
    %13 = arith.subf %9, %12 : vector<56x56xf32>
    %14 = math.exp %13 : vector<56x56xf32>
    %cst_10 = arith.constant dense<0.000000e+00> : vector<56xf32>
    %15 = vector.multi_reduction <add>, %14, %cst_10 [0] : vector<56x56xf32> to vector<56xf32>
    %16 = vector.shape_cast %15 : vector<56xf32> to vector<1x56xf32>
    %17 = tpu.reciprocal %16 {approx = true} : vector<1x56xf32> -> vector<1x56xf32>
    %18 = arith.mulf %16, %17 : vector<1x56xf32>
    %cst_11 = arith.constant 2.000000e+00 : f32
    %19 = vector.broadcast %cst_11 : f32 to vector<1x56xf32>
    %20 = arith.subf %19, %18 : vector<1x56xf32>
    %21 = arith.mulf %17, %20 : vector<1x56xf32>
    %22 = vector.broadcast %21 : vector<1x56xf32> to vector<56x56xf32>
    %23 = arith.mulf %14, %22 : vector<56x56xf32>
    %c0_12 = arith.constant 0 : index
    %c0_13 = arith.constant 0 : index
    %c0_14 = arith.constant 0 : index
    %24 = vector.load %arg3[%c0_12, %c0_13, %c0_14] : memref<1x56x64xf32, #tpu.memory_space<vmem>>, vector<1x56x64xf32>
    %25 = vector.shape_cast %24 : vector<1x56x64xf32> to vector<56x64xf32>
    %cst_15 = arith.constant dense<0.000000e+00> : vector<56x64xf32>
    %26 = tpu.matmul %23, %25, %cst_15 {dimension_numbers = #tpu.dot_dimension_numbers<[1], [0], [0], [1], [0, 0, 1, 1], [], []>} : vector<56x56xf32>, vector<56x64xf32>, vector<56x64xf32> -> vector<56x64xf32>
    %c0_16 = arith.constant 0 : index
    %c0_17 = arith.constant 0 : index
    %c0_18 = arith.constant 0 : index
    %27 = vector.load %arg5[%c0_16, %c0_17, %c0_18] : memref<1x56x64xf32, #tpu.memory_space<vmem>>, vector<1x56x64xf32>
    %28 = vector.shape_cast %27 : vector<1x56x64xf32> to vector<56x64xf32>
    %29 = vector.shape_cast %26 : vector<56x64xf32> to vector<1x56x64xf32>
    tpu.vector_store %arg5[%c0_16, %c0_17, %c0_18], %29 {strides = array<i32>} : memref<1x56x64xf32, #tpu.memory_space<vmem>>, vector<1x56x64xf32>,
    return
  }
  func.func @transform_0(%arg0: i32) -> (i32, i32, i32) {
    %c0_i32 = arith.constant 0 : i32
    %c0_i32_0 = arith.constant 0 : i32
    %c0_i32_1 = arith.constant 0 : i32
    return %arg0, %c0_i32, %c0_i32_0 : i32, i32, i32
  }
  func.func @transform_1(%arg0: i32) -> (i32, i32, i32) {
    %c0_i32 = arith.constant 0 : i32
    %c0_i32_0 = arith.constant 0 : i32
    %c0_i32_1 = arith.constant 0 : i32
    return %arg0, %c0_i32, %c0_i32_0 : i32, i32, i32
  }
  func.func @transform_2(%arg0: i32) -> (i32, i32, i32) {
    %c0_i32 = arith.constant 0 : i32
    %c0_i32_0 = arith.constant 0 : i32
    %c0_i32_1 = arith.constant 0 : i32
    return %arg0, %c0_i32, %c0_i32_0 : i32, i32, i32
  }
  func.func @transform_3(%arg0: i32) -> (i32, i32, i32) {
    %c0_i32 = arith.constant 0 : i32
    %c0_i32_0 = arith.constant 0 : i32
    %c0_i32_1 = arith.constant 0 : i32
    %c0_i32_2 = arith.constant 0 : i32
    return %c0_i32, %c0_i32_0, %c0_i32_1 : i32, i32, i32
  }
  func.func @transform_4(%arg0: i32) -> (i32, i32, i32) {
    %c0_i32 = arith.constant 0 : i32
    %c0_i32_0 = arith.constant 0 : i32
    %c0_i32_1 = arith.constant 0 : i32
    return %arg0, %c0_i32, %c0_i32_0 : i32, i32, i32
  }
}

</mosaic_0001>

<bundles_post_ra>
// kernel: tpu_custom_call.1
= control target key start
LH: loop header
LB: loop body
LE: loop exit
PB: predicated region body
PF: predicated region fallthrough
CT: control target
= control target key end

     0   :  { %s1665_s0 = inlined_call_operand.hbm [shape: f32[8,56,64], index: 0, kind: input, shape index: {}]   ;;  %s1666_s1 = inlined_call_operand.hbm [shape: f32[8,56,64], index: 1, kind: input, shape index: {}]   ;;  %s1667_s2 = inlined_call_operand.hbm [shape: f32[8,56,64], index: 2, kind: input, shape index: {}]   ;;  %s1668_s3 = inlined_call_operand.hbm [shape: f32[1,56,56], index: 3, kind: input, shape index: {}]   ;;  %s1669_s4 = inlined_call_operand.hbm [shape: f32[8,56,64], index: 4, kind: output, shape index: {}]  }
   0x1   :  { %1681 = sst [smem:[#allocation17_spill]] %s1666_s1 }
   0x2   :  { %9 = vsyncpa [#allocation3], 0 }
   0x3   :  { %11 = vsyncpa [#allocation3 + $0x1], 0 }
   0x4   :  { %12 = vsyncpa [#allocation6], 0 }
   0x5   :  { %14 = vsyncpa [#allocation6 + $0x1], 0 }
   0x6   :  { %15 = vsyncpa [#allocation9], 0 }
   0x7   :  { %16 = vsyncpa [#allocation4], 0 }
   0x8   :  { %18 = vsyncpa [#allocation4 + $0x1], 0  ;;  %s1273_s15 = smov 0   ;;  %s1275_s16 = smov 0  }
   0x9   :  { %s1277_s17 = smov 0   ;;  %s1279_s18 = smov 0  }
   0xa LB: > { %1682 = sst [smem:[#allocation15_spill]] %s1231_s17  ;;  %s1294_s19 = sadd.s32 1, %s1235_s18   ;;  %s1235_s18 = sphi %s1279_s18, %s1706_s18   ;;  %s1231_s17 = sphi %s1277_s17, %s1703_s17   ;;  %s1227_s16 = sphi %s1275_s16, %s1705_s16   ;;  %s1223_s15 = sphi %s1273_s15, %s1704_s15  }
   0xb   : > { %s31_s20 = sadd.s32 1, %s1231_s17  ;;  %s28_s21 = ssub.s32 %s1235_s18, %s1294_s19 }
   0xc   : > { %p1670_p0 = scmp.ne.s32.totalorder %s1231_s17, %s1227_s16  ;;  %p29_p1 = scmp.eq.s32.totalorder %s28_s21, 0 }
   0xd   : > { %p39_p2 = scmp.eq.s32.totalorder %s1235_s18, 0  ;;  %p995_p4 = scmp.lt.s32.totalorder %s1235_s18, 8 }
   0xe   : > { %s1303_s22 = scalar_select %p29_p1, %s1231_s17, %s31_s20  }
   0xf   : > { %p40_p3 = por %p39_p2, %p1670_p0  ;;  %s180_s23 = sand.u32 1, %s1231_s17  }
  0x10   : > { %1683 = sst [smem:[#allocation16_spill]] %s1303_s22  ;;  %s1312_s24 = smul.u32 56, %s180_s23 }
  0x11   : > { %s201_s25 = sand.u32 1, %s1235_s18   ;;  %s1316_s26 = smul.u32 896, %s1235_s18 }
  0x12   : > { %p1318_p5 = pnand %p995_p4, %p40_p3  ;;  %s1685_s1 = sld [smem:[#allocation17_spill]] }
  0x13   : > { %s205_s5 = scalar_lea.vmem [#allocation5], %s1312_s24  ;;  %s1331_s7 = scalar_lea.sflag [#allocation6], %s201_s25 }
  0x14   : > { %s212_s6 = sshll.u32 %s205_s5, 4  ;;  %p1337_p7 = pneg %p1318_p5  ;;  %s1329_s6 = int_to_ptr.vmem [resolvable:$true] %s212_s6 }
  0x18   : > { %s1326_s30 = scalar_lea.hbm %s1685_s1, %s1316_s26  ;;  %s1058_s12 = scalar_lea.hbm %s1685_s1, 7168 }
  0x19   : > { %s1053_s8 = scalar_lea.hbm %s1326_s30, 896  ;;  %p1059_p10 = scmp.lt.s32.totalorder %s1326_s30, %s1685_s1 }
  0x1a   : > { %p1054_p6 = scmp.ne.s32.totalorder %s1326_s30, %s1053_s8  ;;  %p1060_p11 = scmp.lt.s32.totalorder %s1058_s12, %s1053_s8 }
  0x1c   : > { %p1056_p8 = pnand %p1337_p7, %p1054_p6  ;;  %p1061_p12 = por %p1060_p11, %p1059_p10 }
  0x1e   : > { %p1057_p9 = pneg %p1056_p8 }
  0x20   : > { %p1062_p13 = pnand %p1061_p12, %p1057_p9 }
  0x22   : > { %1065 = shalt.err (!%p1062_p13)
}
  0x23   : > { %s1066_s20 = scalar_lea.vmem %s1329_s6, 896  ;;  %s1237_s21 = smov [#allocation5]  }
  0x24   : > { %p1067_p1 = scmp.ne.s32.totalorder %s1329_s6, %s1066_s20  ;;  %s1071_s25 = sshll.u32 %s1237_s21, 4  ;;  %s1072_s25 = int_to_ptr.vmem [resolvable:$false] %s1071_s25 }
  0x25   : > { %s1073_s28 = scalar_lea.vmem %s1072_s25, 1792  ;;  %p1074_p4 = scmp.lt.s32.totalorder %s1329_s6, %s1072_s25 }
  0x26   : > { %p1069_p2 = pnand %p1067_p1, %p1337_p7  ;;  %p1075_p6 = scmp.lt.s32.totalorder %s1073_s28, %s1066_s20 }
  0x28   : > { %p1070_p3 = pneg %p1069_p2  ;;  %p1076_p8 = por %p1075_p6, %p1074_p4 }
  0x2a   : > { %p1077_p0 = pnand %p1076_p8, %p1070_p3 }
  0x2c   : > { %1080 = shalt.err (!%p1077_p0)
}
  0x2d   : > { %s1671_s29 = smov 128   ;;  %s1673_s5 = smov 8  }
  0x2e   : > { %986 = dma.hbm_to_vmem [thread:$0]  (!%p1318_p5), %s1326_s30, 896, %s1329_s6, %s1331_s7, %s1671_s29, %s1671_s29, %s1673_s5  }
  0x2f   : > { %s1364_s8 = sadd.s32 4294967295, %s1235_s18   ;;  %s825_s10 = sadd.s32 4294967294, %s1235_s18  }
  0x30   : > { %p44_p0 = scmp.ne.s32.totalorder %s1227_s16, %s1223_s15  ;;  %p1675_p9 = scmp.eq.s32.totalorder %s1364_s8, 0 }
  0x31   : > { %p141_p10 = scmp.eq.s32.totalorder %s1364_s8, 7  ;;  %p147_p11 = scmp.eq.s32.totalorder %s825_s10, 7 }
  0x32   : > { %p1373_p12 = por %p1675_p9, %p44_p0  ;;  %p826_p13 = scmp.ge.s32.totalorder %s1235_s18, 1 }
  0x33   : > { %p1688_p1 = scmp.ne.s32.totalorder %s1231_s17, %s1227_s16  ;;  %p1385_p3 = por %p147_p11, %p44_p0 }
  0x34   : > { %s1687_s11 = scalar_select %p1373_p12, 1, 0 }
  0x35   : > { %p1381_p2 = por %p141_p10, %p1688_p1  ;;  %p154_p4 = scmp.lt.s32.totalorder %s1235_s18, 9 }
  0x36   : > { %s1690_s6 = scalar_select %p1385_p3, 1, 0 }
  0x37   : > { %s1689_s30 = scalar_select %p1381_p2, 1, 0 }
  0x38   : > { %p1390_p6 = pnand %p826_p13, %p154_p4  ;;  %s1240_s13 = smov [#allocation8]  }
  0x39   : > { %s166_s14 = sshll.u32 %s1240_s13, 4  ;;  %s1402_s25 = scalar_lea.hbm %s1665_s0, %s1316_s26  ;;  %s1394_s14 = int_to_ptr.vmem [resolvable:$true] %s166_s14 }
  0x3a   : > { %s1691_s12 = scalar_select %p1390_p6, 1, 0 }
  0x3b   : > { %p976_p8 = pneg %p1390_p6  ;;  %s184_s28 = scalar_lea.vmem [#allocation2], %s1312_s24 }
  0x3c   : > { %s191_s10 = sshll.u32 %s184_s28, 4  ;;  %s181_s13 = scalar_lea.sflag [#allocation3], %s180_s23  ;;  %s1411_s10 = int_to_ptr.vmem [resolvable:$true] %s191_s10 }
  0x3d   : > { %p1407_p0 = pnand %p976_p8, %p1675_p9  ;;  %s1081_s5 = scalar_lea.hbm %s1402_s25, 896 }
  0x3e   : > { %p1082_p10 = scmp.ne.s32.totalorder %s1402_s25, %s1081_s5  ;;  %s1086_s1 = scalar_lea.hbm %s1665_s0, 7168 }
  0x3f   : > { %s1692_s29 = scalar_select %p1407_p0, 1, 0 }
  0x40   : > { %p1084_p11 = pnand %p1082_p10, %p1337_p7  ;;  %p1087_p1 = scmp.lt.s32.totalorder %s1402_s25, %s1665_s0 }
  0x41   : > { %p1088_p4 = scmp.lt.s32.totalorder %s1086_s1, %s1081_s5 }
  0x42   : > { %p1085_p13 = pneg %p1084_p11 }
  0x43   : > { %p1089_p8 = por %p1088_p4, %p1087_p1 }
  0x45   : > { %p1090_p9 = pnand %p1089_p8, %p1085_p13 }
  0x47   : > { %1093 = shalt.err (!%p1090_p9)
}
  0x48   : > { %s1094_s23 = scalar_lea.vmem %s1411_s10, 896  ;;  %s1241_s17 = smov [#allocation2]  }
  0x49   : > { %p1095_p3 = scmp.ne.s32.totalorder %s1411_s10, %s1094_s23  ;;  %s1099_s20 = sshll.u32 %s1241_s17, 4  ;;  %s1100_s20 = int_to_ptr.vmem [resolvable:$false] %s1099_s20 }
  0x4a   : > { %s1101_s21 = scalar_lea.vmem %s1100_s20, 1792  ;;  %p1102_p2 = scmp.lt.s32.totalorder %s1411_s10, %s1100_s20 }
  0x4b   : > { %p1097_p10 = pnand %p1095_p3, %p1337_p7  ;;  %p1103_p12 = scmp.lt.s32.totalorder %s1101_s21, %s1094_s23 }
  0x4d   : > { %p1098_p11 = pneg %p1097_p10  ;;  %p1104_p6 = por %p1103_p12, %p1102_p2 }
  0x4f   : > { %p1105_p0 = pnand %p1104_p6, %p1098_p11 }
  0x51   : > { %1108 = shalt.err (!%p1105_p0)
}
  0x52   : > { %s1693_s1 = smov 8   ;;  %s1694_s22 = smov 128  }
  0x53   : > { %983 = dma.hbm_to_vmem [thread:$0]  (!%p1318_p5), %s1402_s25, 896, %s1411_s10, %s181_s13, %s1694_s22, %s1694_s22, %s1693_s1  }
  0x54   : > { %s1442_s28 = scalar_lea.hbm %s1667_s2, %s1316_s26  ;;  %p1695_p9 = scmp.ne.s32.totalorder %s1692_s29, 0 }
  0x55   : > { %s1120_s23 = scalar_lea.vmem %s1394_s14, 896  ;;  %p1128_p0 = scmp.lt.s32.totalorder %s1394_s14, %s1394_s14 }
  0x56   : > { %p1111_p12 = pneg %p1695_p9  ;;  %p1121_p2 = scmp.ne.s32.totalorder %s1394_s14, %s1120_s23 }
  0x57   : > { %p1129_p13 = scmp.lt.s32.totalorder %s1120_s23, %s1120_s23 }
  0x58   : > { %p1123_p3 = pnand %p1121_p2, %p1111_p12 }
  0x59   : > { %p1130_p1 = por %p1129_p13, %p1128_p0 }
  0x5a   : > { %p1124_p6 = pneg %p1123_p3 }
  0x5c   : > { %p1131_p4 = pnand %p1130_p1, %p1124_p6 }
  0x5e   : > { %1134 = shalt.err (!%p1131_p4)
}
  0x5f   : > { %979 = dma.hbm_to_vmem [thread:$0]  (!%p1695_p9), %s1668_s3, 896, %s1394_s14, [#allocation9], %s1694_s22, %s1694_s22, %s1693_s1  }
  0x60   : > { %s226_s10 = scalar_lea.vmem [#allocation7], %s1312_s24  ;;  %s1135_s20 = scalar_lea.hbm %s1442_s28, 896 }
  0x61   : > { %s233_s13 = sshll.u32 %s226_s10, 4  ;;  %p1136_p8 = scmp.ne.s32.totalorder %s1442_s28, %s1135_s20  ;;  %s234_s13 = int_to_ptr.vmem [resolvable:$true] %s233_s13 }
  0x62   : > { %s1140_s17 = scalar_lea.hbm %s1667_s2, 7168  ;;  %p1141_p12 = scmp.lt.s32.totalorder %s1442_s28, %s1667_s2 }
  0x63   : > { %p1138_p10 = pnand %p1136_p8, %p1337_p7  ;;  %p1142_p2 = scmp.lt.s32.totalorder %s1140_s17, %s1135_s20 }
  0x65   : > { %p1139_p11 = pneg %p1138_p10  ;;  %p1143_p3 = por %p1142_p2, %p1141_p12 }
  0x67   : > { %p1144_p6 = pnand %p1143_p3, %p1139_p11 }
  0x69   : > { %1147 = shalt.err (!%p1144_p6)
}
  0x6a   : > { %s1148_s24 = scalar_lea.vmem %s234_s13, 896  ;;  %s1242_s14 = smov [#allocation7]  }
  0x6b   : > { %p1149_p9 = scmp.ne.s32.totalorder %s234_s13, %s1148_s24  ;;  %s1153_s26 = sshll.u32 %s1242_s14, 4  ;;  %s1154_s26 = int_to_ptr.vmem [resolvable:$false] %s1153_s26 }
  0x6c   : > { %s1155_s25 = scalar_lea.vmem %s1154_s26, 1792  ;;  %p1156_p1 = scmp.lt.s32.totalorder %s234_s13, %s1154_s26 }
  0x6d   : > { %p1151_p0 = pnand %p1149_p9, %p1337_p7  ;;  %p1157_p4 = scmp.lt.s32.totalorder %s1155_s25, %s1148_s24 }
  0x6f   : > { %p1152_p13 = pneg %p1151_p0  ;;  %p1158_p8 = por %p1157_p4, %p1156_p1 }
  0x71   : > { %p1159_p10 = pnand %p1158_p8, %p1152_p13 }
  0x73   : > { %1162 = shalt.err (!%p1159_p10)
}
  0x74   : > { %989 = dma.hbm_to_vmem [thread:$0]  (!%p1318_p5), %s1442_s28, 896, %s234_s13, %s1331_s7, %s1694_s22, %s1694_s22, %s1693_s1  }
  0x75   : > { %p1696_p7 = scmp.ne.s32.totalorder %s1691_s12, 0 }
  0x76   : > { %s1483_s9 = sand.u32 (!%p1696_p7), 1, %s1227_s16   ;;  %p1697_p11 = scmp.ne.s32.totalorder (!%p1696_p7), %s1687_s11, 0 }
  0x77   : > { %245 = sbr.rel (%p1696_p7) target bundleno = 697 (0x2b9), region = 36  ;;  %s248_s20 = scalar_lea.sflag (!%p1696_p7), [#allocation3], %s1483_s9 }
  0x78   : > { %s1486_s10 = smul.u32 (!%p1696_p7), 56, %s1483_s9 }
  0x7a   : > { %s1490_s27 = scalar_lea.vmem (!%p1696_p7), [#allocation2], %s1486_s10 }
  0x7c   : > { %1206 = dma.done.wait (%p1697_p11), %s248_s20, 896  }
  0x7d   : > { %1208 = vsyncadd (%p1697_p11), %s248_s20, 4294966400  ;;  %s256_s7 = sand.u32 1, %s1364_s8   ;;  %s1498_s1 = scalar_lea.vmem [#allocation5], %s1486_s10 }
  0x7e   : > { %s257_s12 = scalar_lea.sflag [#allocation6], %s256_s7 }
  0x7f   : > { %1210 = dma.done.wait (%p1697_p11), %s257_s12, 1792  }
  0x80   : > { %1212 = vsyncadd (%p1697_p11), %s257_s12, 4294965504  ;;  %s1505_s22 = scalar_lea.vmem [#allocation7], %s1486_s10  ;;  %p1698_p5 = scmp.eq.s32.totalorder %s1364_s8, 0 }
  0x82   : > { %1214 = dma.done.wait (%p1698_p5), [#allocation9], 896   ;;  %p1699_p12 = pmov %p1698_p5 }
  0x83   : > { %v1243_v0 = vmov 0.0   ;;  %vm1244_vm0 = vmmov 0   ;;  %vm336_vm1 = vcmask 523264   ;;  %v328_v1 = vld [vmem:[%s1498_s1 + $0x30] sm:$0xff]  ;;  %v327_v2 = vld [vmem:[%s1498_s1 + $0x28] sm:$0xff]  ;;  %v326_v3 = vld [vmem:[%s1498_s1 + $0x20] sm:$0xff] }
  0x84   : > { %1216 = vsyncadd (%p1699_p12), [#allocation9], 4294966400  ;;  %886 = vmatprep.subr.mxu0 %v1243_v0  ;;  %900 = vmatprep.mubr.msk.f32.mxu0 %vm1244_vm0, %v1243_v0  ;;  %v325_v4 = vld [vmem:[%s1498_s1 + $0x18] sm:$0xff]  ;;  %v324_v5 = vld [vmem:[%s1498_s1 + $0x10] sm:$0xff]  ;;  %vm479_vm2 = vcmask 457728   ;;  %s307_s11 = scalar_lea.vmem [#allocation10], %s1486_s10 }
  0x85   : > { %921 = vmatprep.subr.mxu1 %v1243_v0  ;;  %935 = vmatprep.mubr.msk.f32.mxu1 %vm1244_vm0, %v1243_v0  ;;  %v323_v6 = vld [vmem:[%s1498_s1 + $0x8] sm:$0xff]  ;;  %v308_v7 = vld [vmem:[%s1490_s27] sm:$0xff]  ;;  %v322_v8 = vld [vmem:[%s1498_s1] sm:$0xff]  ;;  %s699_s28 = sshll.u32 %s307_s11, 4  ;;  %s963_s13 = smul.u32 896, %s1364_s8  ;;  %s1616_s28 = int_to_ptr.vmem [resolvable:$true] %s699_s28 }
  0x86   : > { %887 = vmatpush3.xpose.msk.msra.mxu0 %vm336_vm1, %v328_v1  ;;  %v315_v9 = vmul.f32 0.125, %v308_v7  ;;  %v309_v10 = vld [vmem:[%s1490_s27 + $0x8] sm:$0xff]  ;;  %v310_v12 = vld [vmem:[%s1490_s27 + $0x10] sm:$0xff]  ;;  %v311_v14 = vld [vmem:[%s1490_s27 + $0x18] sm:$0xff]  ;;  %s686_s5 = scalar_lea.sflag [#allocation4], %s1483_s9  ;;  %s1163_s8 = scalar_lea.vmem %s1616_s28, 896 }
  0x87   : > { %888 = vmatprep.subr.mxu0 %v1243_v0  ;;  %v316_v11 = vmul.f32 0.125, %v309_v10  ;;  %v317_v13 = vmul.f32 0.125, %v310_v12  ;;  %v318_v15 = vmul.f32 0.125, %v311_v14  ;;  %v312_v16 = vld [vmem:[%s1490_s27 + $0x20] sm:$0xff]  ;;  %v313_v18 = vld [vmem:[%s1490_s27 + $0x28] sm:$0xff]  ;;  %v314_v20 = vld [vmem:[%s1490_s27 + $0x30] sm:$0xff]  ;;  %s1622_s17 = scalar_lea.hbm %s1669_s4, %s963_s13  ;;  %p1164_p2 = scmp.ne.s32.totalorder %s1616_s28, %s1163_s8 }
  0x88   : > { %v319_v17 = vmul.f32 0.125, %v312_v16  ;;  %v320_v19 = vmul.f32 0.125, %v313_v18  ;;  %v321_v21 = vmul.f32 0.125, %v314_v20  ;;  %v556_v22 = vld [vmem:[%s1505_s22 + $0x30] sm:$0xff]  ;;  %v555_v23 = vld [vmem:[%s1505_s22 + $0x28] sm:$0xff]  ;;  %v554_v24 = vld [vmem:[%s1505_s22 + $0x20] sm:$0xff] }
  0x89   : > { %922 = vmatpush3.msra.mxu1 %v556_v22  ;;  %v553_v25 = vld [vmem:[%s1505_s22 + $0x18] sm:$0xff]  ;;  %v552_v26 = vld [vmem:[%s1505_s22 + $0x10] sm:$0xff]  ;;  %v551_v27 = vld [vmem:[%s1505_s22 + $0x8] sm:$0xff]  ;;  %p1700_p3 = scmp.ne.s32.totalorder %s1689_s30, 0  ;;  %s1245_s23 = smov [#allocation10]  }
  0x8a   : > { %889 = vmatpush3.xpose.msk.msra.mxu0 %vm336_vm1, %v327_v2  ;;  %923 = vmatprep.subr.mxu1 %v1243_v0  ;;  %v550_v28 = vld [vmem:[%s1505_s22] sm:$0xff]  ;;  %v333_v39 = vld [vmem:[#allocation8 + $0x20] sm:$0xff]  ;;  %v332_v48 = vld [vmem:[#allocation8 + $0x18] sm:$0xff]  ;;  %s1167_s24 = sshll.u32 %s1245_s23, 4  ;;  %s1168_s24 = int_to_ptr.vmem [resolvable:$false] %s1167_s24 }
  0x8b   : > { %890 = vmatprep.subr.mxu0 %v1243_v0  ;;  %924 = vmatpush3.msra.mxu1 %v555_v23  ;;  %v330_v38 = vld [vmem:[#allocation8 + $0x8] sm:$0xff]  ;;  %v329_v42 = vld [vmem:[#allocation8] sm:$0xff]  ;;  %v331_v43 = vld [vmem:[#allocation8 + $0x10] sm:$0xff]  ;;  %p1165_p6 = pnand %p1164_p2, %p1700_p3  ;;  %s1169_s14 = scalar_lea.vmem %s1168_s24, 1792 }
  0x8c   : > { %925 = vmatprep.subr.mxu1 %v1243_v0  ;;  %v334_v41 = vld [vmem:[#allocation8 + $0x28] sm:$0xff]  ;;  %v335_v50 = vld [vmem:[#allocation8 + $0x30] sm:$0xff]  ;;  %p1170_p0 = scmp.lt.s32.totalorder %s1616_s28, %s1168_s24  ;;  %p1171_p13 = scmp.lt.s32.totalorder %s1169_s14, %s1163_s8 }
  0x8d   : > { %926 = vmatpush3.msra.mxu1 %v554_v24  ;;  %p1166_p9 = pneg %p1165_p6 }
  0x8e   : > { %891 = vmatpush3.xpose.msk.msra.mxu0 %vm336_vm1, %v326_v3  ;;  %927 = vmatprep.subr.mxu1 %v1243_v0  ;;  %p1172_p1 = por %p1171_p13, %p1170_p0 }
  0x8f   : > { %892 = vmatprep.subr.mxu0 %v1243_v0  ;;  %928 = vmatpush3.msra.mxu1 %v553_v25 }
  0x90   : > { %929 = vmatprep.subr.mxu1 %v1243_v0  ;;  %p1173_p4 = pnand %p1172_p1, %p1166_p9 }
  0x91   : > { %930 = vmatpush3.msra.mxu1 %v552_v26 }
  0x92   : > { %893 = vmatpush3.xpose.msk.msra.mxu0 %vm336_vm1, %v325_v4  ;;  %931 = vmatprep.subr.mxu1 %v1243_v0 }
  0x93   : > { %894 = vmatprep.subr.mxu0 %v1243_v0  ;;  %932 = vmatpush3.msra.mxu1 %v551_v27 }
  0x94   : > { %933 = vmatprep.subr.mxu1 %v1243_v0 }
  0x95   : > { %934 = vmatpush3.msra.mxu1 %v550_v28 }
  0x96   : > { %895 = vmatpush3.xpose.msk.msra.mxu0 %vm336_vm1, %v324_v5 }
  0x97   : > { %896 = vmatprep.subr.mxu0 %v1243_v0 }
  0x9a   : > { %897 = vmatpush3.xpose.msk.msra.mxu0 %vm336_vm1, %v323_v6 }
  0x9b   : > { %898 = vmatprep.subr.mxu0 %v1243_v0 }
  0x9e   : > { %899 = vmatpush3.xpose.msk.msra.mxu0 %vm336_vm1, %v322_v8 }
  0xa1   : > { %901 = vmatmul.mubr.msk.f32.vlgmr.msra.gmra.mxu0 %vm336_vm1, %v315_v9 }
  0xa2   : > { %903 = vmatprep.mubr.msk.f32.mxu0 %vm1244_vm0, %v1243_v0 }
  0xa5   : > { %904 = vmatmul.mubr.msk.f32.gmra.mxu0 %vm336_vm1, %v316_v11 }
  0xa6   : > { %906 = vmatprep.mubr.msk.f32.mxu0 %vm1244_vm0, %v1243_v0 }
  0xa9   : > { %907 = vmatmul.mubr.msk.f32.gmra.mxu0 %vm336_vm1, %v317_v13 }
  0xaa   : > { %909 = vmatprep.mubr.msk.f32.mxu0 %vm1244_vm0, %v1243_v0 }
  0xad   : > { %910 = vmatmul.mubr.msk.f32.gmra.mxu0 %vm336_vm1, %v318_v15 }
  0xae   : > { %912 = vmatprep.mubr.msk.f32.mxu0 %vm1244_vm0, %v1243_v0 }
  0xb1   : > { %913 = vmatmul.mubr.msk.f32.gmra.mxu0 %vm336_vm1, %v319_v17 }
  0xb2   : > { %915 = vmatprep.mubr.msk.f32.mxu0 %vm1244_vm0, %v1243_v0 }
  0xb5   : > { %916 = vmatmul.mubr.msk.f32.gmra.mxu0 %vm336_vm1, %v320_v19 }
  0xb6   : > { %918 = vmatprep.mubr.msk.f32.mxu0 %vm1244_vm0, %v1243_v0 }
  0xb9   : > { %919 = vmatmul.mubr.msk.f32.gmra.mxu0 %vm336_vm1, %v321_v21 }
 0x161   : > { %v445_v29 = vpop.f32.mrf.mxu0 }
 0x162   : > { %v446_v51 = vadd.f32 %v445_v29, %v329_v42 }
 0x163   : > { %v902_v30 = vpop.f32.mrf.mxu0 }
 0x164   : > { %v480_v61 = vsel %vm479_vm2, %v446_v51, -inf }
 0x165   : > { %v450_v31 = vpop.f32.mrf.mxu0 }
 0x166   : > { %v451_v45 = vadd.f32 %v450_v31, %v330_v38 }
 0x167   : > { %v905_v32 = vpop.f32.mrf.mxu0 }
 0x168   : > { %v481_v55 = vsel %vm479_vm2, %v451_v45, -inf }
 0x169   : > { %v455_v33 = vpop.f32.mrf.mxu0 }
 0x16a   : > { %v456_v52 = vadd.f32 %v455_v33, %v331_v43 }
 0x16b   : > { %v908_v34 = vpop.f32.mrf.mxu0 }
 0x16c   : > { %v482_v62 = vsel %vm479_vm2, %v456_v52, -inf }
 0x16d   : > { %v460_v35 = vpop.f32.mrf.mxu0 }
 0x16e   : > { %v461_v56 = vadd.f32 %v460_v35, %v332_v48 }
 0x16f   : > { %v911_v36 = vpop.f32.mrf.mxu0 }
 0x170   : > { %v483_v3 = vsel %vm479_vm2, %v461_v56, -inf }
 0x171   : > { %v465_v37 = vpop.f32.mrf.mxu0 }
 0x172   : > { %v466_v46 = vadd.f32 %v465_v37, %v333_v39 }
 0x173   : > { %v914_v40 = vpop.f32.mrf.mxu0 }
 0x174   : > { %v484_v57 = vsel %vm479_vm2, %v466_v46, -inf }
 0x175   : > { %v470_v44 = vpop.f32.mrf.mxu0  ;;  %v485_v1 = vmax.f32 %v480_v61, %v484_v57 }
 0x176   : > { %v471_v47 = vadd.f32 %v470_v44, %v334_v41 }
 0x177   : > { %v917_v49 = vpop.f32.mrf.mxu0 }
 0x178   : > { %v486_v53 = vsel %vm479_vm2, %v471_v47, -inf }
 0x179   : > { %v475_v54 = vpop.f32.mrf.mxu0  ;;  %v487_v59 = vmax.f32 %v481_v55, %v486_v53 }
 0x17a   : > { %v476_v58 = vadd.f32 %v475_v54, %v335_v50 }
 0x17b   : > { %v920_v60 = vpop.f32.mrf.mxu0  ;;  %v490_v4 = vmax.f32 %v485_v1, %v487_v59 }
 0x17c   : > { %v488_v63 = vsel %vm479_vm2, %v476_v58, -inf }
 0x17d   : > { %v489_v2 = vmax.f32 %v482_v62, %v488_v63 }
 0x17f   : > { %v491_v5 = vmax.f32 %v489_v2, %v483_v3 }
 0x181   : > { %v492_v6 = vmax.f32 %v490_v4, %v491_v5 }
 0x183   : > { %v493_v7 = vrot.slane %v492_v6, 4 }
 0x185   : > { %v494_v8 = vmax.f32 %v492_v6, %v493_v7 }
 0x187   : > { %v495_v9 = vrot.slane %v494_v8, 2 }
 0x189   : > { %v496_v10 = vmax.f32 %v494_v8, %v495_v9 }
 0x18b   : > { %v497_v11 = vrot.slane %v496_v10, 1 }
 0x18d   : > { %v498_v12 = vmax.f32 %v496_v10, %v497_v11 }
 0x18f   : > { %v499_v13 = vsub.f32 %v446_v51, %v498_v12  ;;  %v500_v14 = vsub.f32 %v451_v45, %v498_v12  ;;  %v501_v15 = vsub.f32 %v456_v52, %v498_v12  ;;  %v502_v16 = vsub.f32 %v461_v56, %v498_v12 }
 0x190   : > { %v503_v17 = vsub.f32 %v466_v46, %v498_v12  ;;  %v504_v21 = vsub.f32 %v471_v47, %v498_v12  ;;  %v505_v23 = vsub.f32 %v476_v58, %v498_v12 }
 0x191   : > { %v506_v18 = vmul.f32 1.442695, %v499_v13  ;;  %v508_v19 = vmul.f32 1.442695, %v500_v14  ;;  %v510_v20 = vmul.f32 1.442695, %v501_v15 }
 0x192   : > { %v512_v22 = vmul.f32 1.442695, %v502_v16  ;;  %v514_v24 = vmul.f32 1.442695, %v503_v17  ;;  %v516_v25 = vmul.f32 1.442695, %v504_v21 }
 0x193   : > { %1037 = vpow2.f32 %v506_v18  ;;  %v518_v26 = vmul.f32 1.442695, %v505_v23 }
 0x194   : > { %1039 = vpow2.f32 %v508_v19 }
 0x195   : > { %1041 = vpow2.f32 %v510_v20 }
 0x196   : > { %1043 = vpow2.f32 %v512_v22 }
 0x197   : > { %1045 = vpow2.f32 %v514_v24 }
 0x198   : > { %1047 = vpow2.f32 %v516_v25 }
 0x199   : > { %1049 = vpow2.f32 %v518_v26 }
 0x1a0   : > { %v1038_v27 = vpop.eup %1037 }
 0x1a1   : > { %v1040_v28 = vpop.eup %1039  ;;  %v520_v29 = vsel %vm479_vm2, %v1038_v27, 0.0 }
 0x1a2   : > { %v1042_v30 = vpop.eup %1041  ;;  %v521_v31 = vsel %vm479_vm2, %v1040_v28, 0.0 }
 0x1a3   : > { %v1044_v32 = vpop.eup %1043  ;;  %v522_v33 = vadd.f32 %v521_v31, %v520_v29  ;;  %v523_v34 = vsel %vm479_vm2, %v1042_v30, 0.0 }
 0x1a4   : > { %v1046_v35 = vpop.eup %1045  ;;  %v525_v37 = vsel %vm479_vm2, %v1044_v32, 0.0 }
 0x1a5   : > { %v524_v36 = vadd.f32 %v523_v34, %v522_v33  ;;  %v1048_v38 = vpop.eup %1047  ;;  %v527_v40 = vsel %vm479_vm2, %v1046_v35, 0.0 }
 0x1a6   : > { %v1050_v41 = vpop.eup %1049  ;;  %v529_v43 = vsel %vm479_vm2, %v1048_v38, 0.0 }
 0x1a7   : > { %v526_v39 = vadd.f32 %v525_v37, %v524_v36  ;;  %v531_v45 = vsel %vm479_vm2, %v1050_v41, 0.0 }
 0x1a9   : > { %v528_v42 = vadd.f32 %v527_v40, %v526_v39 }
 0x1ab   : > { %v530_v44 = vadd.f32 %v529_v43, %v528_v42 }
 0x1ad   : > { %v532_v46 = vadd.f32 %v531_v45, %v530_v44 }
 0x1af   : > { %v533_v47 = vrot.slane %v532_v46, 4 }
 0x1b1   : > { %v534_v48 = vadd.f32 %v533_v47, %v532_v46 }
 0x1b3   : > { %v535_v49 = vrot.slane %v534_v48, 2 }
 0x1b5   : > { %v536_v50 = vadd.f32 %v535_v49, %v534_v48 }
 0x1b7   : > { %v537_v51 = vrot.slane %v536_v50, 1 }
 0x1b9   : > { %v538_v52 = vadd.f32 %v537_v51, %v536_v50 }
 0x1bb   : > { %1051 = vrcp.f32 %v538_v52 }
 0x1c8   : > { %v1052_v53 = vpop.eup %1051 }
 0x1c9   : > { %v540_v54 = vmul.f32 %v1052_v53, %v538_v52 }
 0x1cb   : > { %v541_v55 = vsub.f32 2.0, %v540_v54 }
 0x1cd   : > { %v542_v56 = vmul.f32 %v1052_v53, %v541_v55 }
 0x1cf   : > { %v543_v57 = vmul.f32 %v1038_v27, %v542_v56  ;;  %v544_v58 = vmul.f32 %v1040_v28, %v542_v56  ;;  %v545_v59 = vmul.f32 %v1042_v30, %v542_v56  ;;  %v546_v60 = vmul.f32 %v1044_v32, %v542_v56 }
 0x1d0   : > { %v547_v61 = vmul.f32 %v1046_v35, %v542_v56  ;;  %v548_v62 = vmul.f32 %v1048_v38, %v542_v56  ;;  %v549_v63 = vmul.f32 %v1050_v41, %v542_v56 }
 0x1d1   : > { %936 = vmatmul.mubr.msk.f32.vlgmr.msra.gmra.mxu1 %vm479_vm2, %v543_v57 }
 0x1d2   : > { %938 = vmatprep.mubr.msk.f32.mxu1 %vm1244_vm0, %v1243_v0 }
 0x1d5   : > { %939 = vmatmul.mubr.msk.f32.gmra.mxu1 %vm479_vm2, %v544_v58 }
 0x1d6   : > { %941 = vmatprep.mubr.msk.f32.mxu1 %vm1244_vm0, %v1243_v0 }
 0x1d9   : > { %942 = vmatmul.mubr.msk.f32.gmra.mxu1 %vm479_vm2, %v545_v59 }
 0x1da   : > { %944 = vmatprep.mubr.msk.f32.mxu1 %vm1244_vm0, %v1243_v0 }
 0x1dd   : > { %945 = vmatmul.mubr.msk.f32.gmra.mxu1 %vm479_vm2, %v546_v60 }
 0x1de   : > { %947 = vmatprep.mubr.msk.f32.mxu1 %vm1244_vm0, %v1243_v0 }
 0x1e1   : > { %948 = vmatmul.mubr.msk.f32.gmra.mxu1 %vm479_vm2, %v547_v61 }
 0x1e2   : > { %950 = vmatprep.mubr.msk.f32.mxu1 %vm1244_vm0, %v1243_v0 }
 0x1e5   : > { %951 = vmatmul.mubr.msk.f32.gmra.mxu1 %vm479_vm2, %v548_v62 }
 0x1e6   : > { %953 = vmatprep.mubr.msk.f32.mxu1 %vm1244_vm0, %v1243_v0 }
 0x1e9   : > { %954 = vmatmul.mubr.msk.f32.gmra.mxu1 %vm479_vm2, %v549_v63 }
 0x291   : > { %v644_v1 = vpop.f32.mrf.mxu1 }
 0x292   : > { %678 = vst.msk [vmem:[%s307_s11] sm:$0xff] %vm336_vm1, %v644_v1 }
 0x293   : > { %v937_v2 = vpop.f32.mrf.mxu1 }
 0x295   : > { %v649_v3 = vpop.f32.mrf.mxu1 }
 0x296   : > { %679 = vst.msk [vmem:[%s307_s11 + $0x8] sm:$0xff] %vm336_vm1, %v649_v3 }
 0x297   : > { %v940_v4 = vpop.f32.mrf.mxu1 }
 0x299   : > { %v654_v5 = vpop.f32.mrf.mxu1 }
 0x29a   : > { %680 = vst.msk [vmem:[%s307_s11 + $0x10] sm:$0xff] %vm336_vm1, %v654_v5 }
 0x29b   : > { %v943_v6 = vpop.f32.mrf.mxu1 }
 0x29d   : > { %v659_v7 = vpop.f32.mrf.mxu1 }
 0x29e   : > { %681 = vst.msk [vmem:[%s307_s11 + $0x18] sm:$0xff] %vm336_vm1, %v659_v7 }
 0x29f   : > { %v946_v0 = vpop.f32.mrf.mxu1 }
 0x2a1   : > { %v664_v8 = vpop.f32.mrf.mxu1 }
 0x2a2   : > { %682 = vst.msk [vmem:[%s307_s11 + $0x20] sm:$0xff] %vm336_vm1, %v664_v8 }
 0x2a3   : > { %v949_v9 = vpop.f32.mrf.mxu1 }
 0x2a5   : > { %v669_v10 = vpop.f32.mrf.mxu1 }
 0x2a6   : > { %683 = vst.msk [vmem:[%s307_s11 + $0x28] sm:$0xff] %vm336_vm1, %v669_v10 }
 0x2a7   : > { %v952_v11 = vpop.f32.mrf.mxu1 }
 0x2a9   : > { %v674_v12 = vpop.f32.mrf.mxu1 }
 0x2aa   : > { %684 = vst.msk [vmem:[%s307_s11 + $0x30] sm:$0xff] %vm336_vm1, %v674_v12 }
 0x2ab   : > { %v955_v13 = vpop.f32.mrf.mxu1 }
 0x2ac   : > { %1176 = shalt.err (!%p1173_p4)
}
 0x2ad   : > { %s1177_s26 = scalar_lea.hbm %s1622_s17, 896  ;;  %s1181_s20 = scalar_lea.hbm %s1669_s4, 7168 }
 0x2ae   : > { %p1178_p8 = scmp.ne.s32.totalorder %s1622_s17, %s1177_s26  ;;  %p1182_p11 = scmp.lt.s32.totalorder %s1622_s17, %s1669_s4 }
 0x2af   : > { %p1183_p5 = scmp.lt.s32.totalorder %s1181_s20, %s1177_s26 }
 0x2b0   : > { %p1179_p10 = pnand %p1178_p8, %p1700_p3 }
 0x2b1   : > { %p1184_p12 = por %p1183_p5, %p1182_p11 }
 0x2b2   : > { %p1180_p7 = pneg %p1179_p10 }
 0x2b4   : > { %p1185_p2 = pnand %p1184_p12, %p1180_p7 }
 0x2b6   : > { %1188 = shalt.err (!%p1185_p2)
}
 0x2b7   : > { %s1246_s12 = smov 128   ;;  %s1247_s1 = smov 8  }
 0x2b8   : > { %974 = dma.vmem_to_hbm [thread:$0]  (%p1700_p3), %s1616_s28, 896, %s1622_s17, %s686_s5, %s1246_s12, %s1246_s12, %s1247_s1  }
 0x2b9 PF: > { %p997_p6 = scmp.ge.s32.totalorder %s1235_s18, 2  ;;  %s714_s22 = sand.u32 1, %s1223_s15  }
 0x2ba   : > { %p1701_p9 = scmp.ne.s32.totalorder %s1690_s6, 0  ;;  %s715_s11 = scalar_lea.sflag [#allocation4], %s714_s22 }
 0x2bc   : > { %p991_p0 = pnand %p997_p6, %p1701_p9 }
 0x2be   : > { %p992_p13 = pneg %p991_p0 }
 0x2c0   : > { %1218 = dma.done.wait (%p992_p13), %s715_s11, 896  }
 0x2c1   : > { %1220 = vsyncadd (%p992_p13), %s715_s11, 4294966400  ;;  %s1702_s13 = sld [smem:[#allocation15_spill]]  ;;  %p21_p1 = scmp.ge.s32.totalorder %s1294_s19, 10  }
 0x2c2   : > { %s1703_s17 = sld [smem:[#allocation16_spill]]  ;;  %s1704_s15 = smov %s1227_s16 }
 0x2c3   : > { %s1706_s18 = smov %s1294_s19  ;;  %23 = sbr.rel (!%p21_p1) target bundleno = 10 (0xa), region = 109 }
 0x2c7   : > { %s1705_s16 = smov %s1702_s13 }
 0x2c8   :  { %720 = vsyncpa [#allocation3], 1 }
 0x2c9   :  { %722 = vsyncpa [#allocation3 + $0x1], 1 }
 0x2ca   :  { %723 = vsyncpa [#allocation6], 1 }
 0x2cb   :  { %725 = vsyncpa [#allocation6 + $0x1], 1 }
 0x2cc   :  { %726 = vsyncpa [#allocation9], 1 }
 0x2cd   :  { %727 = vsyncpa [#allocation4], 1 }
 0x2ce   :  { %729 = vsyncpa [#allocation4 + $0x1], 1 }

</bundles_post_ra>
